<compile_context>
chip_gen: v6e
topology: v6e:2x2x1
jax: 0.10.0
libtpu: 0.0.40
codegen_flags: <defaults>
</compile_context>

<pallas_src>
import functools

import jax
import jax.numpy as jnp
from jax.experimental import pallas as pl
from jax.experimental.pallas import tpu as pltpu


def _round_up(x: int, m: int) -> int:
    return ((x + m - 1) // m) * m


def rnd_fused_kernel(obs_ref, w1_ref, b1_ref, w2_ref, b2_ref, loss_ref, *,
                     inv_o, compute_dtype):
    """One batch tile: obs (TB, D) -> per-row loss stored as (1, TB//128, 128)."""
    # obs streams in its native dtype; cast to the MXU compute dtype IN-KERNEL
    # (no separate wrapper-side astype pass through HBM).
    x = obs_ref[...].astype(compute_dtype)                               # (TB, D)

    # Fused first layer of both nets: (TB, 2H), f32 accumulate on the MXU.
    h = jnp.dot(x, w1_ref[...], preferred_element_type=jnp.float32) + b1_ref[...]
    h = jnp.maximum(h, 0.0)                                              # ReLU in f32 (VPU)
    h = h.astype(compute_dtype)                                          # back for 2nd MXU pass

    # Fused second layer directly produces diff = res - rnd_res  (TB, O), f32.
    diff = jnp.dot(h, w2_ref[...], preferred_element_type=jnp.float32) + b2_ref[...]

    sq = diff * diff                                                     # f32 elementwise
    row = jnp.sum(sq, axis=1) * inv_o                                    # (TB,)  mean over features

    # Dense store: TB losses laid out as full (TB//128, 128) blocks, batch-major.
    loss_ref[...] = row.reshape(loss_ref.shape)


def rnd_curiosity_loss(obs, params, *, block_b=4096, compute_dtype=jnp.bfloat16):
    """obs: (B, D).  params: dict of per-net weights/biases.  Returns (B, 1) f32."""
    B, D = obs.shape

    # --- fuse frozen target + predictor into one weight pair (tiny, done once) ---
    w1 = jnp.concatenate([params["w1t"], params["w1p"]], axis=1)     # (D, 2H)
    b1 = jnp.concatenate([params["b1t"], params["b1p"]], axis=1)     # (1, 2H)
    w2 = jnp.concatenate([-params["w2t"], params["w2p"]], axis=0)    # (2H, O)
    b2 = params["b2p"] - params["b2t"]                               # (1, O)

    # Pad fused hidden width to a multiple of 128 (zero cols/rows are exact no-ops;
    # keeps the first matmul's output lane-dense).
    H2 = w1.shape[1]
    H2p = _round_up(H2, 128)
    if H2p != H2:
        w1 = jnp.pad(w1, ((0, 0), (0, H2p - H2)))
        b1 = jnp.pad(b1, ((0, 0), (0, H2p - H2)))
        w2 = jnp.pad(w2, ((0, H2p - H2), (0, 0)))
        H2 = H2p
    O = w2.shape[1]

    w1 = w1.astype(compute_dtype)
    w2 = w2.astype(compute_dtype)
    b1 = b1.astype(jnp.float32)
    b2 = b2.astype(jnp.float32)
    # TODO(synk): optional fp8 (e4m3) obs/weight streaming path for v7x (needs accuracy check).

    obs_itemsize = jnp.dtype(obs.dtype).itemsize
    cd_itemsize = jnp.dtype(compute_dtype).itemsize

    # --- VMEM-aware batch-tile selection (tb a multiple of 128) ---
    try:
        vmem_cap = int(pltpu.get_tpu_info().vmem_capacity_bytes)
    except Exception:
        vmem_cap = 64 * 1024 * 1024          # v7x physical VMEM, conservative fallback
    weight_bytes = 2 * (D * H2 * cd_itemsize + H2 * 4 + H2 * O * cd_itemsize + O * 4)
    per_row = (2 * D * obs_itemsize          # double-buffered obs tile
               + D * cd_itemsize             # in-kernel cast copy
               + H2 * (4 + cd_itemsize)      # hidden f32 + cast
               + 8 * O + 8)                  # diff/sq + output
    budget = max(int(vmem_cap * 0.45) - weight_bytes, 128 * per_row)
    tb_cap = max(128, (budget // per_row) // 128 * 128)

    tb = max(128, _round_up(min(block_b, B), 128))
    tb = min(tb, tb_cap)
    # Prefer >= 2 grid steps so both v7x TensorCores get work.
    if B > 128 and pl.cdiv(B, tb) < 2:
        tb = max(128, _round_up(pl.cdiv(B, 2), 128))
    g = pl.cdiv(B, tb)            # no jnp.pad of obs: partial last block handled by Pallas
    rows_per_block = tb // 128

    kernel = functools.partial(rnd_fused_kernel,
                               inv_o=1.0 / float(O),
                               compute_dtype=compute_dtype)

    cost = pl.CostEstimate(
        flops=int(2 * B * (D * H2 + H2 * O)),
        transcendentals=0,
        bytes_accessed=int(B * D * obs_itemsize + weight_bytes // 2 + B * 4),
    )

    out = pl.pallas_call(
        kernel,
        out_shape=jax.ShapeDtypeStruct((g, rows_per_block, 128), jnp.float32),
        grid=(g,),
        in_specs=[
            pl.BlockSpec((tb, D), lambda i: (i, 0)),      # obs tile, streamed (native dtype)
            pl.BlockSpec((D, H2), lambda i: (0, 0)),      # fused W1, VMEM-resident
            pl.BlockSpec((1, H2), lambda i: (0, 0)),      # fused B1, resident
            pl.BlockSpec((H2, O), lambda i: (0, 0)),      # fused W2, resident
            pl.BlockSpec((1, O), lambda i: (0, 0)),       # fused B2, resident
        ],
        out_specs=pl.BlockSpec((1, rows_per_block, 128), lambda i: (i, 0, 0)),
        compiler_params=pltpu.CompilerParams(
            dimension_semantics=("parallel",),            # shard batch across TCs (v7x)
            vmem_limit_bytes=int(vmem_cap * 0.9),
        ),
        cost_estimate=cost,
    )(obs, w1, b1, w2, b2)

    # (g, tb//128, 128) row-major == losses in batch order; drop OOB tail, restore (B, 1).
    return out.reshape(g * tb, 1)[:B]


def make_params(key, obs_dim, hidden, out_dim):
    ks = jax.random.split(key, 8)
    s1 = 1.0 / jnp.sqrt(obs_dim)
    s2 = 1.0 / jnp.sqrt(hidden)
    return {
        # frozen random target net
        "w1t": jax.random.normal(ks[0], (obs_dim, hidden), jnp.float32) * s1,
        "b1t": jax.random.normal(ks[1], (1, hidden), jnp.float32) * 0.1,
        "w2t": jax.random.normal(ks[2], (hidden, out_dim), jnp.float32) * s2,
        "b2t": jax.random.normal(ks[3], (1, out_dim), jnp.float32) * 0.1,
        # predictor net
        "w1p": jax.random.normal(ks[4], (obs_dim, hidden), jnp.float32) * s1,
        "b1p": jax.random.normal(ks[5], (1, hidden), jnp.float32) * 0.1,
        "w2p": jax.random.normal(ks[6], (hidden, out_dim), jnp.float32) * s2,
        "b2p": jax.random.normal(ks[7], (1, out_dim), jnp.float32) * 0.1,
    }


def reference(obs, p, compute_dtype):
    """Unfused reference mirroring the PyTorch module (and the kernel's precision policy)."""
    f32 = jnp.float32
    hi = jax.lax.Precision.HIGHEST
    q = lambda a: a.astype(compute_dtype).astype(f32)
    dot = functools.partial(jnp.dot, precision=hi)

    x = q(obs)
    h_t = jnp.maximum(dot(x, q(p["w1t"])) + p["b1t"].astype(f32), 0.0)
    h_p = jnp.maximum(dot(x, q(p["w1p"])) + p["b1p"].astype(f32), 0.0)
    rnd = dot(q(h_t), q(p["w2t"])) + p["b2t"].astype(f32)
    res = dot(q(h_p), q(p["w2p"])) + p["b2p"].astype(f32)
    return jnp.mean((res - rnd) ** 2, axis=1, keepdims=True)


if __name__ == "__main__":
    B, D, H, O = 384, 64, 64, 32        # fused hidden = 2H = 128 lanes
    key = jax.random.PRNGKey(0)
    k_obs, k_par = jax.random.split(key)
    obs = jax.random.normal(k_obs, (B, D), jnp.float32)
    params = make_params(k_par, D, H, O)

    # f32 debug path (exact module semantics); exercises the even 2-step grid split
    # and the partial-last-block path (B=384, tb=256).
    loss_f32 = rnd_curiosity_loss(obs, params, compute_dtype=jnp.float32)
    jax.block_until_ready(loss_f32)
    ref_f32 = reference(obs, params, jnp.float32)
    assert loss_f32.shape == (B, 1)
    assert jnp.allclose(loss_f32, ref_f32, rtol=1e-2, atol=1e-2)

    # bf16 streaming production path (f32 MXU accumulate, f32 elementwise).
    loss_bf16 = rnd_curiosity_loss(obs, params)
    jax.block_until_ready(loss_bf16)
    ref_bf16 = reference(obs, params, jnp.bfloat16)
    assert loss_bf16.shape == (B, 1)
    assert jnp.allclose(loss_bf16, ref_bf16, rtol=2e-2, atol=2e-2)

    print("KERNEL_OK")
</pallas_src>

<mosaic_0001>
module attributes {stable_mosaic.version = 11 : i64} {
  func.func @rnd_fused_kernel(%arg0: i32, %arg1: memref<256x64xf32, #tpu.memory_space<vmem>>, %arg2: memref<64x128xf32, #tpu.memory_space<vmem>>, %arg3: memref<1x128xf32, #tpu.memory_space<vmem>>, %arg4: memref<128x32xf32, #tpu.memory_space<vmem>>, %arg5: memref<1x32xf32, #tpu.memory_space<vmem>>, %arg6: memref<1x2x128xf32, #tpu.memory_space<vmem>>) attributes {dimension_semantics = [#tpu.dimension_semantics<parallel>], iteration_bounds = array<i64: 2>, scalar_prefetch = 0 : i64, scratch_operands = 0 : i64, tpu.core_type = #tpu.core_type<tc>, window_params = [{transform_indices = @transform_0, window_bounds = array<i64: 256, 64>}, {pipeline_mode = #tpu.pipeline_mode<synchronous>, transform_indices = @transform_1, window_bounds = array<i64: 64, 128>}, {pipeline_mode = #tpu.pipeline_mode<synchronous>, transform_indices = @transform_2, window_bounds = array<i64: 1, 128>}, {pipeline_mode = #tpu.pipeline_mode<synchronous>, transform_indices = @transform_3, window_bounds = array<i64: 128, 32>}, {pipeline_mode = #tpu.pipeline_mode<synchronous>, transform_indices = @transform_4, window_bounds = array<i64: 1, 32>}, {transform_indices = @transform_5, window_bounds = array<i64: 1, 2, 128>}]} {
    %c0 = arith.constant 0 : index
    %c0_0 = arith.constant 0 : index
    %0 = vector.load %arg1[%c0, %c0_0] : memref<256x64xf32, #tpu.memory_space<vmem>>, vector<256x64xf32>
    %c0_1 = arith.constant 0 : index
    %c0_2 = arith.constant 0 : index
    %1 = vector.load %arg2[%c0_1, %c0_2] : memref<64x128xf32, #tpu.memory_space<vmem>>, vector<64x128xf32>
    %cst = arith.constant dense<0.000000e+00> : vector<256x128xf32>
    %2 = tpu.matmul %0, %1, %cst {dimension_numbers = #tpu.dot_dimension_numbers<[1], [0], [0], [1], [0, 0, 1, 1], [], []>} : vector<256x64xf32>, vector<64x128xf32>, vector<256x128xf32> -> vector<256x128xf32>
    %c0_3 = arith.constant 0 : index
    %c0_4 = arith.constant 0 : index
    %3 = vector.load %arg3[%c0_3, %c0_4] : memref<1x128xf32, #tpu.memory_space<vmem>>, vector<1x128xf32>
    %4 = vector.broadcast %3 : vector<1x128xf32> to vector<256x128xf32>
    %5 = arith.addf %2, %4 : vector<256x128xf32>
    %cst_5 = arith.constant 0.000000e+00 : f32
    %6 = vector.broadcast %cst_5 : f32 to vector<256x128xf32>
    %7 = arith.maximumf %5, %6 : vector<256x128xf32>
    %c0_6 = arith.constant 0 : index
    %c0_7 = arith.constant 0 : index
    %8 = vector.load %arg4[%c0_6, %c0_7] : memref<128x32xf32, #tpu.memory_space<vmem>>, vector<128x32xf32>
    %cst_8 = arith.constant dense<0.000000e+00> : vector<256x32xf32>
    %9 = tpu.matmul %7, %8, %cst_8 {dimension_numbers = #tpu.dot_dimension_numbers<[1], [0], [0], [1], [0, 0, 1, 1], [], []>} : vector<256x128xf32>, vector<128x32xf32>, vector<256x32xf32> -> vector<256x32xf32>
    %c0_9 = arith.constant 0 : index
    %c0_10 = arith.constant 0 : index
    %10 = vector.load %arg5[%c0_9, %c0_10] : memref<1x32xf32, #tpu.memory_space<vmem>>, vector<1x32xf32>
    %11 = vector.broadcast %10 : vector<1x32xf32> to vector<256x32xf32>
    %12 = arith.addf %9, %11 : vector<256x32xf32>
    %13 = arith.mulf %12, %12 : vector<256x32xf32>
    %cst_11 = arith.constant dense<0.000000e+00> : vector<256xf32>
    %14 = vector.multi_reduction <add>, %13, %cst_11 [1] : vector<256x32xf32> to vector<256xf32>
    %cst_12 = arith.constant 3.125000e-02 : f32
    %15 = vector.broadcast %cst_12 : f32 to vector<256xf32>
    %16 = arith.mulf %14, %15 : vector<256xf32>
    %17 = vector.shape_cast %16 : vector<256xf32> to vector<1x2x128xf32>
    %c0_13 = arith.constant 0 : index
    %c0_14 = arith.constant 0 : index
    %c0_15 = arith.constant 0 : index
    %18 = vector.load %arg6[%c0_13, %c0_14, %c0_15] : memref<1x2x128xf32, #tpu.memory_space<vmem>>, vector<1x2x128xf32>
    tpu.vector_store %arg6[%c0_13, %c0_14, %c0_15], %17 {strides = array<i32>} : memref<1x2x128xf32, #tpu.memory_space<vmem>>, vector<1x2x128xf32>,
    return
  }
  func.func @transform_0(%arg0: i32) -> (i32, i32) {
    %c0_i32 = arith.constant 0 : i32
    %c0_i32_0 = arith.constant 0 : i32
    return %arg0, %c0_i32 : i32, i32
  }
  func.func @transform_1(%arg0: i32) -> (i32, i32) {
    %c0_i32 = arith.constant 0 : i32
    %c0_i32_0 = arith.constant 0 : i32
    %c0_i32_1 = arith.constant 0 : i32
    return %c0_i32, %c0_i32_0 : i32, i32
  }
  func.func @transform_2(%arg0: i32) -> (i32, i32) {
    %c0_i32 = arith.constant 0 : i32
    %c0_i32_0 = arith.constant 0 : i32
    %c0_i32_1 = arith.constant 0 : i32
    return %c0_i32, %c0_i32_0 : i32, i32
  }
  func.func @transform_3(%arg0: i32) -> (i32, i32) {
    %c0_i32 = arith.constant 0 : i32
    %c0_i32_0 = arith.constant 0 : i32
    %c0_i32_1 = arith.constant 0 : i32
    return %c0_i32, %c0_i32_0 : i32, i32
  }
  func.func @transform_4(%arg0: i32) -> (i32, i32) {
    %c0_i32 = arith.constant 0 : i32
    %c0_i32_0 = arith.constant 0 : i32
    %c0_i32_1 = arith.constant 0 : i32
    return %c0_i32, %c0_i32_0 : i32, i32
  }
  func.func @transform_5(%arg0: i32) -> (i32, i32, i32) {
    %c0_i32 = arith.constant 0 : i32
    %c0_i32_0 = arith.constant 0 : i32
    %c0_i32_1 = arith.constant 0 : i32
    return %arg0, %c0_i32, %c0_i32_0 : i32, i32, i32
  }
}

</mosaic_0001>

<bundles_post_ra>
// kernel: tpu_custom_call.1
= control target key start
LH: loop header
LB: loop body
LE: loop exit
PB: predicated region body
PF: predicated region fallthrough
CT: control target
= control target key end

     0   :  { %10 = vsyncpa [#allocation3], 0  ;;  %s2288_s0 = inlined_call_operand.vmem [shape: f32[384,64], index: 0, kind: input, shape index: {}]   ;;  %s2289_s1 = inlined_call_operand.vmem [shape: f32[64,128], index: 1, kind: input, shape index: {}]   ;;  %s2290_s2 = inlined_call_operand.vmem [shape: f32[1,128], index: 2, kind: input, shape index: {}]   ;;  %s2291_s3 = inlined_call_operand.vmem [shape: f32[128,32], index: 3, kind: input, shape index: {}]   ;;  %s2292_s4 = inlined_call_operand.vmem [shape: f32[1,32], index: 4, kind: input, shape index: {}]   ;;  %s2293_s5 = inlined_call_operand.hbm [shape: f32[2,2,128], index: 5, kind: output, shape index: {}]  }
   0x1   :  { %12 = vsyncpa [#allocation3 + $0x1], 0  ;;  %s1795_s18 = smov 0   ;;  %s1797_s19 = smov 0  }
   0x2   :  { %s1799_s20 = smov 0   ;;  %s1801_s21 = smov 0  }
   0x3 LB: > { %s1352_s22 = sadd.s32 4294967295, %s1762_s21   ;;  %s1353_s23 = sadd.s32 4294967294, %s1762_s21   ;;  %s1762_s21 = sphi %s1801_s21, %s2299_s21   ;;  %s1758_s20 = sphi %s1799_s20, %s2298_s20   ;;  %s1754_s19 = sphi %s1797_s19, %s2297_s19   ;;  %s1750_s18 = sphi %s1795_s18, %s2296_s18  }
   0x4   : > { %s1818_s24 = sadd.s32 1, %s1762_s21   ;;  %s135_s25 = sadd.s32 1, %s1758_s20 }
   0x5   : > { %s132_s26 = ssub.s32 %s1762_s21, %s1818_s24  ;;  %p145_p0 = scmp.ne.s32.totalorder %s1758_s20, %s1754_s19 }
   0x6   : > { %p133_p1 = scmp.eq.s32.totalorder %s132_s26, 0  ;;  %p146_p2 = scmp.eq.s32.totalorder %s1352_s22, 1 }
   0x7   : > { %p151_p3 = scmp.ne.s32.totalorder %s1754_s19, %s1750_s18  ;;  %p152_p4 = scmp.eq.s32.totalorder %s1353_s23, 1 }
   0x8   : > { %s1828_s27 = scalar_select %p133_p1, %s1758_s20, %s135_s25  }
   0x9   : > { %p1830_p5 = por %p146_p2, %p145_p0  ;;  %p1834_p6 = por %p152_p4, %p151_p3 }
   0xa   : > { %p1356_p7 = scmp.ge.s32.totalorder %s1762_s21, 1  ;;  %p199_p8 = scmp.lt.s32.totalorder %s1762_s21, 3 }
   0xc   : > { %p200_p9 = pnand %p1356_p7, %p199_p8 }
   0xd   : > { %s1846_s9 = sshll.u32 (!%p200_p9), %s1352_s22, 5  ;;  %s228_s16 = sand.u32 (!%p200_p9), 1, %s1754_s19  }
   0xe   : > { %203 = sbr.rel (%p200_p9) target bundleno = 682 (0x2aa), region = 40  ;;  %p236_p10 = scmp.lt.s32.totalorder (!%p200_p9), %s1846_s9, 47 }
   0xf   : > { %s1357_s17 = sshll.u32 (!%p200_p9), %s228_s16, 1  ;;  %s2249_s30 = scalar_lea.hbm (!%p200_p9), %s2293_s5, %s1846_s9 }
  0x10   : > { %s2209_s22 = scalar_lea.vmem (!%p200_p9), [#allocation2], %s1357_s17  ;;  %s1281_s6 = scalar_lea.sflag (!%p200_p9), [#allocation3], %s228_s16 }
  0x11   : > { %s1764_s10 = smov (!%p200_p9), [#allocation2]  }
  0x13   : > { %v284_v0 = vld [vmem:[%s2289_s1 + $0x38] sm:$0xff]  ;;  %v283_v1 = vld [vmem:[%s2289_s1 + $0x30] sm:$0xff]  ;;  %v282_v2 = vld [vmem:[%s2289_s1 + $0x28] sm:$0xff]  ;;  %s237_s14 = scalar_select %p236_p10, %s1846_s9, 47  ;;  %vm292_vm0 = vcmask 523264   ;;  %vm926_vm1 = vcmask 261120  }
  0x14   : > { %1487 = vmatprep.subr.mxu0 %v284_v0  ;;  %v661_v3 = vld [vmem:[%s2291_s3 + $0x78] sm:$0xff]  ;;  %v281_v4 = vld [vmem:[%s2289_s1 + $0x20] sm:$0xff]  ;;  %v660_v5 = vld [vmem:[%s2291_s3 + $0x70] sm:$0xff]  ;;  %vm1082_vm2 = vcmask 130112   ;;  %vm1089_vm3 = vcmask 195712   ;;  %vm1096_vm4 = vcmask 261312  }
  0x15   : > { %1488 = vmatpush3.msra.mxu0 %v284_v0  ;;  %1631 = vmatprep.subr.mxu1 %v661_v3  ;;  %s1359_s23 = sshll.u32 %s237_s14, 3  ;;  %v280_v6 = vld [vmem:[%s2289_s1 + $0x18] sm:$0xff]  ;;  %v659_v7 = vld [vmem:[%s2291_s3 + $0x68] sm:$0xff]  ;;  %v279_v9 = vld [vmem:[%s2289_s1 + $0x10] sm:$0xff]  ;;  %vm1103_vm5 = vcmask 326912   ;;  %vm1110_vm6 = vcmask 392512  }
  0x16   : > { %1489 = vmatprep.subr.mxu0 %v283_v1  ;;  %1647 = vmatpush3.msra.mxu1 %v661_v3  ;;  %s1868_s7 = scalar_lea.vmem %s2288_s0, %s1359_s23  ;;  %v658_v10 = vld [vmem:[%s2291_s3 + $0x60] sm:$0xff]  ;;  %v278_v11 = vld [vmem:[%s2289_s1 + $0x8] sm:$0xff]  ;;  %v657_v12 = vld [vmem:[%s2291_s3 + $0x58] sm:$0xff]  ;;  %vm1117_vm7 = vcmask 458112   ;;  %vm1124_vm8 = vcmask 523712   ;;  %vm1131_vm9 = vcmask 589312  }
  0x17   : > { %1490 = vmatpush3.msra.mxu0 %v283_v1  ;;  %1632 = vmatprep.subr.mxu1 %v660_v5  ;;  %v245_v8 = vld [vmem:[%s1868_s7] sm:$0xff]  ;;  %v656_v14 = vld [vmem:[%s2291_s3 + $0x50] sm:$0xff]  ;;  %v246_v15 = vld [vmem:[%s1868_s7 + $0x8] sm:$0xff]  ;;  %vm1138_vm10 = vcmask 654912   ;;  %vm1145_vm11 = vcmask 720512   ;;  %vm1152_vm12 = vcmask 786112  }
  0x18   : > { %1491 = vmatprep.subr.mxu0 %v282_v2  ;;  %1648 = vmatpush3.msra.mxu1 %v660_v5  ;;  %v277_v13 = vld [vmem:[%s2289_s1] sm:$0xff]  ;;  %v247_v16 = vld [vmem:[%s1868_s7 + $0x10] sm:$0xff]  ;;  %v655_v17 = vld [vmem:[%s2291_s3 + $0x48] sm:$0xff]  ;;  %vm1159_vm13 = vcmask 851712   ;;  %vm1166_vm14 = vcmask 917312   ;;  %vm1173_vm15 = vcmask 982912  }
  0x19   : > { %1492 = vmatpush3.msra.mxu0 %v282_v2  ;;  %1633 = vmatprep.subr.mxu1 %v659_v7  ;;  %v248_v18 = vld [vmem:[%s1868_s7 + $0x18] sm:$0xff]  ;;  %v249_v19 = vld [vmem:[%s1868_s7 + $0x20] sm:$0xff]  ;;  %v250_v21 = vld [vmem:[%s1868_s7 + $0x28] sm:$0xff]  ;;  %s1294_s23 = sshll.u32 %s2209_s22, 4  ;;  %s1295_s23 = int_to_ptr.vmem [resolvable:$true] %s1294_s23 }
  0x1a   : > { %1493 = vmatprep.subr.mxu0 %v281_v4  ;;  %1503 = vmatprep.mubr.msk.f32.mxu0 %vm292_vm0, %v245_v8  ;;  %v654_v20 = vld [vmem:[%s2291_s3 + $0x40] sm:$0xff]  ;;  %v251_v22 = vld [vmem:[%s1868_s7 + $0x30] sm:$0xff]  ;;  %v653_v23 = vld [vmem:[%s2291_s3 + $0x38] sm:$0xff]  ;;  %s1702_s8 = scalar_lea.vmem %s1295_s23, 32 }
  0x1b   : > { %1494 = vmatpush3.msra.mxu0 %v281_v4  ;;  %1649 = vmatpush3.msra.mxu1 %v659_v7  ;;  %v252_v24 = vld [vmem:[%s1868_s7 + $0x38] sm:$0xff]  ;;  %v253_v25 = vld [vmem:[%s1868_s7 + $0x40] sm:$0xff]  ;;  %v652_v26 = vld [vmem:[%s2291_s3 + $0x30] sm:$0xff]  ;;  %p1703_p11 = scmp.ne.s32.totalorder %s1295_s23, %s1702_s8 }
  0x1c   : > { %1495 = vmatprep.subr.mxu0 %v280_v6  ;;  %1634 = vmatprep.subr.mxu1 %v658_v10  ;;  %v254_v27 = vld [vmem:[%s1868_s7 + $0x48] sm:$0xff]  ;;  %v255_v28 = vld [vmem:[%s1868_s7 + $0x50] sm:$0xff]  ;;  %v256_v30 = vld [vmem:[%s1868_s7 + $0x58] sm:$0xff] }
  0x1d   : > { %1496 = vmatpush3.msra.mxu0 %v280_v6  ;;  %1650 = vmatpush3.msra.mxu1 %v658_v10  ;;  %v651_v29 = vld [vmem:[%s2291_s3 + $0x28] sm:$0xff]  ;;  %v257_v31 = vld [vmem:[%s1868_s7 + $0x60] sm:$0xff]  ;;  %v259_v34 = vld [vmem:[%s1868_s7 + $0x70] sm:$0xff]  ;;  %p1704_p12 = pnand %p1703_p11, %p1830_p5 }
  0x1e   : > { %1497 = vmatprep.subr.mxu0 %v279_v9  ;;  %1635 = vmatprep.subr.mxu1 %v657_v12  ;;  %v650_v32 = vld [vmem:[%s2291_s3 + $0x20] sm:$0xff]  ;;  %v258_v33 = vld [vmem:[%s1868_s7 + $0x68] sm:$0xff]  ;;  %v260_v35 = vld [vmem:[%s1868_s7 + $0x78] sm:$0xff] }
  0x1f   : > { %1498 = vmatpush3.msra.mxu0 %v279_v9  ;;  %1651 = vmatpush3.msra.mxu1 %v657_v12  ;;  %v261_v36 = vld [vmem:[%s1868_s7 + $0x80] sm:$0xff]  ;;  %v262_v37 = vld [vmem:[%s1868_s7 + $0x88] sm:$0xff]  ;;  %v263_v38 = vld [vmem:[%s1868_s7 + $0x90] sm:$0xff]  ;;  %p1705_p13 = pneg %p1704_p12 }
  0x20   : > { %1499 = vmatprep.subr.mxu0 %v278_v11  ;;  %1636 = vmatprep.subr.mxu1 %v656_v14  ;;  %v264_v39 = vld [vmem:[%s1868_s7 + $0x98] sm:$0xff]  ;;  %v265_v40 = vld [vmem:[%s1868_s7 + $0xa0] sm:$0xff]  ;;  %v266_v41 = vld [vmem:[%s1868_s7 + $0xa8] sm:$0xff] }
  0x21   : > { %1500 = vmatpush3.msra.mxu0 %v278_v11  ;;  %1652 = vmatpush3.msra.mxu1 %v656_v14  ;;  %v267_v42 = vld [vmem:[%s1868_s7 + $0xb0] sm:$0xff]  ;;  %v268_v43 = vld [vmem:[%s1868_s7 + $0xb8] sm:$0xff]  ;;  %v269_v44 = vld [vmem:[%s1868_s7 + $0xc0] sm:$0xff] }
  0x22   : > { %1501 = vmatprep.subr.mxu0 %v277_v13  ;;  %1637 = vmatprep.subr.mxu1 %v655_v17  ;;  %v270_v45 = vld [vmem:[%s1868_s7 + $0xc8] sm:$0xff]  ;;  %v271_v46 = vld [vmem:[%s1868_s7 + $0xd0] sm:$0xff]  ;;  %v272_v47 = vld [vmem:[%s1868_s7 + $0xd8] sm:$0xff] }
  0x23   : > { %1502 = vmatpush3.msra.mxu0 %v277_v13  ;;  %1653 = vmatpush3.msra.mxu1 %v655_v17  ;;  %v273_v48 = vld [vmem:[%s1868_s7 + $0xe0] sm:$0xff]  ;;  %v274_v49 = vld [vmem:[%s1868_s7 + $0xe8] sm:$0xff]  ;;  %v275_v50 = vld [vmem:[%s1868_s7 + $0xf0] sm:$0xff] }
  0x24   : > { %1504 = vmatmul.mubr.msk.f32.vlgmr.msra.gmra.mxu0 %vm292_vm0, %v246_v15  ;;  %1551 = vmatprep.subr.mxu0 %v661_v3  ;;  %v276_v51 = vld [vmem:[%s1868_s7 + $0xf8] sm:$0xff]  ;;  %v648_v53 = vld [vmem:[%s2291_s3 + $0x10] sm:$0xff]  ;;  %v647_v54 = vld [vmem:[%s2291_s3 + $0x8] sm:$0xff]  ;;  %s1706_s7 = sshll.u32 %s1764_s10, 4  ;;  %s1707_s7 = int_to_ptr.vmem [resolvable:$false] %s1706_s7 }
  0x25   : > { %1506 = vmatprep.mubr.msk.f32.mxu0 %vm292_vm0, %v247_v16  ;;  %1552 = vmatpush3.msra.mxu0 %v661_v3  ;;  %v649_v52 = vld [vmem:[%s2291_s3 + $0x18] sm:$0xff]  ;;  %v646_v55 = vld [vmem:[%s2291_s3] sm:$0xff]  ;;  %s1708_s11 = scalar_lea.vmem %s1707_s7, 64  ;;  %p1709_p0 = scmp.lt.s32.totalorder %s1295_s23, %s1707_s7 }
  0x26   : > { %1553 = vmatprep.subr.mxu0 %v660_v5  ;;  %1638 = vmatprep.subr.mxu1 %v654_v20  ;;  %v1988_v56 = vld [vmem:[%s2290_s2] ss:$0 sm:$0xff]  ;;  %p1710_p1 = scmp.lt.s32.totalorder %s1708_s11, %s1702_s8 }
  0x27   : > { %1554 = vmatpush3.msra.mxu0 %v660_v5  ;;  %1654 = vmatpush3.msra.mxu1 %v654_v20 }
  0x28   : > { %1507 = vmatmul.mubr.msk.f32.gmra.mxu0 %vm292_vm0, %v248_v18  ;;  %1555 = vmatprep.subr.mxu0 %v659_v7  ;;  %p1711_p2 = por %p1710_p1, %p1709_p0 }
  0x29   : > { %1509 = vmatprep.mubr.msk.f32.mxu0 %vm292_vm0, %v249_v19  ;;  %1556 = vmatpush3.msra.mxu0 %v659_v7 }
  0x2a   : > { %1557 = vmatprep.subr.mxu0 %v658_v10  ;;  %1639 = vmatprep.subr.mxu1 %v653_v23  ;;  %p1712_p3 = pnand %p1711_p2, %p1705_p13 }
  0x2b   : > { %1558 = vmatpush3.msra.mxu0 %v658_v10  ;;  %1655 = vmatpush3.msra.mxu1 %v653_v23 }
  0x2c   : > { %1510 = vmatmul.mubr.msk.f32.gmra.mxu0 %vm292_vm0, %v250_v21  ;;  %1559 = vmatprep.subr.mxu0 %v657_v12 }
  0x2d   : > { %1512 = vmatprep.mubr.msk.f32.mxu0 %vm292_vm0, %v251_v22  ;;  %1560 = vmatpush3.msra.mxu0 %v657_v12 }
  0x2e   : > { %1561 = vmatprep.subr.mxu0 %v656_v14  ;;  %1640 = vmatprep.subr.mxu1 %v652_v26 }
  0x2f   : > { %1562 = vmatpush3.msra.mxu0 %v656_v14  ;;  %1656 = vmatpush3.msra.mxu1 %v652_v26 }
  0x30   : > { %1513 = vmatmul.mubr.msk.f32.gmra.mxu0 %vm292_vm0, %v252_v24  ;;  %1563 = vmatprep.subr.mxu0 %v655_v17 }
  0x31   : > { %1515 = vmatprep.mubr.msk.f32.mxu0 %vm292_vm0, %v253_v25  ;;  %1564 = vmatpush3.msra.mxu0 %v655_v17 }
  0x32   : > { %1565 = vmatprep.subr.mxu0 %v654_v20  ;;  %1641 = vmatprep.subr.mxu1 %v651_v29 }
  0x33   : > { %1566 = vmatpush3.msra.mxu0 %v654_v20  ;;  %1657 = vmatpush3.msra.mxu1 %v651_v29 }
  0x34   : > { %1516 = vmatmul.mubr.msk.f32.gmra.mxu0 %vm292_vm0, %v254_v27  ;;  %1567 = vmatprep.subr.mxu0 %v653_v23 }
  0x35   : > { %1518 = vmatprep.mubr.msk.f32.mxu0 %vm292_vm0, %v255_v28  ;;  %1568 = vmatpush3.msra.mxu0 %v653_v23 }
  0x36   : > { %1569 = vmatprep.subr.mxu0 %v652_v26  ;;  %1642 = vmatprep.subr.mxu1 %v650_v32 }
  0x37   : > { %1570 = vmatpush3.msra.mxu0 %v652_v26  ;;  %1658 = vmatpush3.msra.mxu1 %v650_v32 }
  0x38   : > { %1519 = vmatmul.mubr.msk.f32.gmra.mxu0 %vm292_vm0, %v256_v30  ;;  %1571 = vmatprep.subr.mxu0 %v651_v29 }
  0x39   : > { %1521 = vmatprep.mubr.msk.f32.mxu0 %vm292_vm0, %v257_v31  ;;  %1572 = vmatpush3.msra.mxu0 %v651_v29 }
  0x3a   : > { %1573 = vmatprep.subr.mxu0 %v650_v32  ;;  %1643 = vmatprep.subr.mxu1 %v649_v52 }
  0x3b   : > { %1574 = vmatpush3.msra.mxu0 %v650_v32  ;;  %1659 = vmatpush3.msra.mxu1 %v649_v52 }
  0x3c   : > { %1522 = vmatmul.mubr.msk.f32.gmra.mxu0 %vm292_vm0, %v258_v33  ;;  %1575 = vmatprep.subr.mxu0 %v649_v52 }
  0x3d   : > { %1524 = vmatprep.mubr.msk.f32.mxu0 %vm292_vm0, %v259_v34  ;;  %1576 = vmatpush3.msra.mxu0 %v649_v52 }
  0x3e   : > { %1577 = vmatprep.subr.mxu0 %v648_v53  ;;  %1644 = vmatprep.subr.mxu1 %v648_v53 }
  0x3f   : > { %1578 = vmatpush3.msra.mxu0 %v648_v53  ;;  %1660 = vmatpush3.msra.mxu1 %v648_v53 }
  0x40   : > { %1525 = vmatmul.mubr.msk.f32.gmra.mxu0 %vm292_vm0, %v260_v35  ;;  %1579 = vmatprep.subr.mxu0 %v647_v54 }
  0x41   : > { %1527 = vmatprep.mubr.msk.f32.mxu0 %vm292_vm0, %v261_v36  ;;  %1645 = vmatprep.subr.mxu1 %v647_v54 }
  0x42   : > { %1580 = vmatpush3.msra.mxu0 %v647_v54  ;;  %1661 = vmatpush3.msra.mxu1 %v647_v54 }
  0x43   : > { %1581 = vmatprep.subr.mxu0 %v646_v55  ;;  %1646 = vmatprep.subr.mxu1 %v646_v55 }
  0x44   : > { %1528 = vmatmul.mubr.msk.f32.gmra.mxu0 %vm292_vm0, %v262_v37  ;;  %1662 = vmatpush3.msra.mxu1 %v646_v55 }
  0x45   : > { %1530 = vmatprep.mubr.msk.f32.mxu0 %vm292_vm0, %v263_v38  ;;  %1582 = vmatpush3.msra.mxu0 %v646_v55 }
  0x48   : > { %1531 = vmatmul.mubr.msk.f32.gmra.mxu0 %vm292_vm0, %v264_v39 }
  0x49   : > { %1533 = vmatprep.mubr.msk.f32.mxu0 %vm292_vm0, %v265_v40 }
  0x4c   : > { %1534 = vmatmul.mubr.msk.f32.gmra.mxu0 %vm292_vm0, %v266_v41 }
  0x4d   : > { %1536 = vmatprep.mubr.msk.f32.mxu0 %vm292_vm0, %v267_v42 }
  0x50   : > { %1537 = vmatmul.mubr.msk.f32.gmra.mxu0 %vm292_vm0, %v268_v43 }
  0x51   : > { %1539 = vmatprep.mubr.msk.f32.mxu0 %vm292_vm0, %v269_v44 }
  0x54   : > { %1540 = vmatmul.mubr.msk.f32.gmra.mxu0 %vm292_vm0, %v270_v45 }
  0x55   : > { %1542 = vmatprep.mubr.msk.f32.mxu0 %vm292_vm0, %v271_v46 }
  0x58   : > { %1543 = vmatmul.mubr.msk.f32.gmra.mxu0 %vm292_vm0, %v272_v47 }
  0x59   : > { %1545 = vmatprep.mubr.msk.f32.mxu0 %vm292_vm0, %v273_v48 }
  0x5c   : > { %1546 = vmatmul.mubr.msk.f32.gmra.mxu0 %vm292_vm0, %v274_v49 }
  0x5d   : > { %1548 = vmatprep.mubr.msk.f32.mxu0 %vm292_vm0, %v275_v50 }
  0x60   : > { %1549 = vmatmul.mubr.msk.f32.gmra.mxu0 %vm292_vm0, %v276_v51  ;;  %vm1180_vm0 = vcmask 1048512  }
  0xe4   : > { %v1505_v57 = vpop.f32.mrf.mxu0 }
  0xe5   : > { %v461_v58 = vadd.f32 %v1505_v57, %v1988_v56 }
  0xe6   : > { %v455_v59 = vpop.f32.mrf.mxu0 }
  0xe7   : > { %v456_v60 = vadd.f32 %v1988_v56, %v455_v59  ;;  %v615_v63 = vmax.f32 %v461_v58, 0.0 }
  0xe8   : > { %v1508_v61 = vpop.f32.mrf.mxu0 }
  0xe9   : > { %v614_v62 = vmax.f32 %v456_v60, 0.0  ;;  %v471_v0 = vadd.f32 %v1508_v61, %v1988_v56 }
  0xea   : > { %v465_v1 = vpop.f32.mrf.mxu0 }
  0xeb   : > { %v466_v2 = vadd.f32 %v1988_v56, %v465_v1  ;;  %1583 = vmatprep.mubr.f32.mxu0 %v614_v62  ;;  %v617_v5 = vmax.f32 %v471_v0, 0.0 }
  0xec   : > { %v1511_v3 = vpop.f32.mrf.mxu0  ;;  %1584 = vmatmul.mubr.f32.vlgmr.msra.gmra.mxu0 %v615_v63 }
  0xed   : > { %v616_v4 = vmax.f32 %v466_v2, 0.0  ;;  %v481_v6 = vadd.f32 %v1511_v3, %v1988_v56 }
  0xee   : > { %v475_v7 = vpop.f32.mrf.mxu0 }
  0xef   : > { %1586 = vmatprep.mubr.f32.mxu0 %v616_v4  ;;  %v476_v8 = vadd.f32 %v1988_v56, %v475_v7  ;;  %v619_v11 = vmax.f32 %v481_v6, 0.0 }
  0xf0   : > { %v1514_v9 = vpop.f32.mrf.mxu0  ;;  %1587 = vmatmul.mubr.f32.gmra.mxu0 %v617_v5 }
  0xf1   : > { %v618_v10 = vmax.f32 %v476_v8, 0.0  ;;  %v491_v12 = vadd.f32 %v1514_v9, %v1988_v56 }
  0xf2   : > { %v485_v13 = vpop.f32.mrf.mxu0 }
  0xf3   : > { %v486_v14 = vadd.f32 %v1988_v56, %v485_v13  ;;  %1589 = vmatprep.mubr.f32.mxu1 %v618_v10  ;;  %v621_v17 = vmax.f32 %v491_v12, 0.0 }
  0xf4   : > { %v1517_v15 = vpop.f32.mrf.mxu0  ;;  %1590 = vmatmul.mubr.f32.vlgmr.msra.gmra.mxu1 %v619_v11 }
  0xf5   : > { %v620_v16 = vmax.f32 %v486_v14, 0.0  ;;  %v501_v18 = vadd.f32 %v1517_v15, %v1988_v56 }
  0xf6   : > { %v495_v19 = vpop.f32.mrf.mxu0 }
  0xf7   : > { %v496_v20 = vadd.f32 %v1988_v56, %v495_v19  ;;  %1592 = vmatprep.mubr.f32.mxu1 %v620_v16  ;;  %v623_v23 = vmax.f32 %v501_v18, 0.0 }
  0xf8   : > { %v1520_v21 = vpop.f32.mrf.mxu0  ;;  %1593 = vmatmul.mubr.f32.gmra.mxu1 %v621_v17 }
  0xf9   : > { %v622_v22 = vmax.f32 %v496_v20, 0.0  ;;  %v511_v24 = vadd.f32 %v1520_v21, %v1988_v56 }
  0xfa   : > { %v505_v25 = vpop.f32.mrf.mxu0 }
  0xfb   : > { %v506_v26 = vadd.f32 %v1988_v56, %v505_v25  ;;  %1595 = vmatprep.mubr.f32.mxu1 %v622_v22  ;;  %v625_v29 = vmax.f32 %v511_v24, 0.0 }
  0xfc   : > { %v1523_v27 = vpop.f32.mrf.mxu0  ;;  %1596 = vmatmul.mubr.f32.gmra.mxu1 %v623_v23 }
  0xfd   : > { %v624_v28 = vmax.f32 %v506_v26, 0.0  ;;  %v521_v30 = vadd.f32 %v1523_v27, %v1988_v56  ;;  %v2025_v26 = vld [vmem:[%s2292_s4] ss:$0 sm:$0xff] }
  0xfe   : > { %v515_v31 = vpop.f32.mrf.mxu0 }
  0xff   : > { %v516_v32 = vadd.f32 %v1988_v56, %v515_v31  ;;  %1598 = vmatprep.mubr.f32.mxu1 %v624_v28  ;;  %v627_v35 = vmax.f32 %v521_v30, 0.0 }
 0x100   : > { %v1526_v33 = vpop.f32.mrf.mxu0  ;;  %1599 = vmatmul.mubr.f32.gmra.mxu1 %v625_v29 }
 0x101   : > { %v626_v34 = vmax.f32 %v516_v32, 0.0  ;;  %v531_v36 = vadd.f32 %v1526_v33, %v1988_v56 }
 0x102   : > { %v525_v37 = vpop.f32.mrf.mxu0 }
 0x103   : > { %v526_v38 = vadd.f32 %v1988_v56, %v525_v37  ;;  %1601 = vmatprep.mubr.f32.mxu1 %v626_v34  ;;  %v629_v41 = vmax.f32 %v531_v36, 0.0 }
 0x104   : > { %v1529_v39 = vpop.f32.mrf.mxu0  ;;  %1602 = vmatmul.mubr.f32.gmra.mxu1 %v627_v35 }
 0x105   : > { %v628_v40 = vmax.f32 %v526_v38, 0.0  ;;  %v541_v42 = vadd.f32 %v1529_v39, %v1988_v56 }
 0x106   : > { %v535_v43 = vpop.f32.mrf.mxu0 }
 0x107   : > { %v536_v44 = vadd.f32 %v1988_v56, %v535_v43  ;;  %1604 = vmatprep.mubr.f32.mxu1 %v628_v40  ;;  %v631_v48 = vmax.f32 %v541_v42, 0.0 }
 0x108   : > { %v1532_v45 = vpop.f32.mrf.mxu0  ;;  %1605 = vmatmul.mubr.f32.gmra.mxu1 %v629_v41 }
 0x109   : > { %v630_v46 = vmax.f32 %v536_v44, 0.0  ;;  %v551_v47 = vadd.f32 %v1532_v45, %v1988_v56 }
 0x10a   : > { %v545_v49 = vpop.f32.mrf.mxu0 }
 0x10b   : > { %v546_v50 = vadd.f32 %v1988_v56, %v545_v49  ;;  %1607 = vmatprep.mubr.f32.mxu1 %v630_v46  ;;  %v633_v51 = vmax.f32 %v551_v47, 0.0 }
 0x10c   : > { %1608 = vmatmul.mubr.f32.gmra.mxu1 %v631_v48  ;;  %v1535_v52 = vpop.f32.mrf.mxu0 }
 0x10d   : > { %v632_v53 = vmax.f32 %v546_v50, 0.0  ;;  %v561_v54 = vadd.f32 %v1535_v52, %v1988_v56 }
 0x10e   : > { %v555_v55 = vpop.f32.mrf.mxu0 }
 0x10f   : > { %1610 = vmatprep.mubr.f32.mxu1 %v632_v53  ;;  %v556_v57 = vadd.f32 %v1988_v56, %v555_v55  ;;  %v635_v58 = vmax.f32 %v561_v54, 0.0 }
 0x110   : > { %1611 = vmatmul.mubr.f32.gmra.mxu1 %v633_v51  ;;  %v1538_v59 = vpop.f32.mrf.mxu0 }
 0x111   : > { %v634_v60 = vmax.f32 %v556_v57, 0.0  ;;  %v571_v61 = vadd.f32 %v1538_v59, %v1988_v56 }
 0x112   : > { %v565_v62 = vpop.f32.mrf.mxu0 }
 0x113   : > { %1613 = vmatprep.mubr.f32.mxu1 %v634_v60  ;;  %v566_v63 = vadd.f32 %v1988_v56, %v565_v62  ;;  %v637_v0 = vmax.f32 %v571_v61, 0.0 }
 0x114   : > { %1614 = vmatmul.mubr.f32.gmra.mxu1 %v635_v58  ;;  %v1541_v1 = vpop.f32.mrf.mxu0 }
 0x115   : > { %v636_v2 = vmax.f32 %v566_v63, 0.0  ;;  %v581_v3 = vadd.f32 %v1541_v1, %v1988_v56 }
 0x116   : > { %v575_v4 = vpop.f32.mrf.mxu0 }
 0x117   : > { %1616 = vmatprep.mubr.f32.mxu1 %v636_v2  ;;  %v576_v5 = vadd.f32 %v1988_v56, %v575_v4  ;;  %v639_v6 = vmax.f32 %v581_v3, 0.0 }
 0x118   : > { %1617 = vmatmul.mubr.f32.gmra.mxu1 %v637_v0  ;;  %v1544_v7 = vpop.f32.mrf.mxu0 }
 0x119   : > { %v638_v8 = vmax.f32 %v576_v5, 0.0  ;;  %v591_v9 = vadd.f32 %v1544_v7, %v1988_v56 }
 0x11a   : > { %v585_v10 = vpop.f32.mrf.mxu0 }
 0x11b   : > { %1619 = vmatprep.mubr.f32.mxu1 %v638_v8  ;;  %v586_v11 = vadd.f32 %v1988_v56, %v585_v10  ;;  %v641_v12 = vmax.f32 %v591_v9, 0.0 }
 0x11c   : > { %1620 = vmatmul.mubr.f32.gmra.mxu1 %v639_v6  ;;  %v1547_v13 = vpop.f32.mrf.mxu0 }
 0x11d   : > { %v640_v14 = vmax.f32 %v586_v11, 0.0  ;;  %v601_v15 = vadd.f32 %v1547_v13, %v1988_v56 }
 0x11e   : > { %v595_v16 = vpop.f32.mrf.mxu0 }
 0x11f   : > { %1622 = vmatprep.mubr.f32.mxu1 %v640_v14  ;;  %v596_v17 = vadd.f32 %v1988_v56, %v595_v16  ;;  %v643_v18 = vmax.f32 %v601_v15, 0.0 }
 0x120   : > { %1623 = vmatmul.mubr.f32.gmra.mxu1 %v641_v12  ;;  %v1550_v19 = vpop.f32.mrf.mxu0 }
 0x121   : > { %v642_v20 = vmax.f32 %v596_v17, 0.0  ;;  %v611_v21 = vadd.f32 %v1550_v19, %v1988_v56 }
 0x122   : > { %v605_v22 = vpop.f32.mrf.mxu0 }
 0x123   : > { %1625 = vmatprep.mubr.f32.mxu1 %v642_v20  ;;  %v606_v23 = vadd.f32 %v1988_v56, %v605_v22  ;;  %v645_v24 = vmax.f32 %v611_v21, 0.0 }
 0x124   : > { %1626 = vmatmul.mubr.f32.gmra.mxu1 %v643_v18 }
 0x125   : > { %v644_v25 = vmax.f32 %v606_v23, 0.0 }
 0x127   : > { %1628 = vmatprep.mubr.f32.mxu1 %v644_v25 }
 0x128   : > { %1629 = vmatmul.mubr.f32.gmra.mxu1 %v645_v24 }
 0x1ac   : > { %v1585_v27 = vpop.f32.mrf.mxu0 }
 0x1ad   : > { %v741_v28 = vadd.f32 %v1585_v27, %v2025_v26 }
 0x1ae   : > { %v735_v29 = vpop.f32.mrf.mxu0 }
 0x1af   : > { %v895_v30 = vmul.f32 %v741_v28, %v741_v28  ;;  %v736_v31 = vadd.f32 %v2025_v26, %v735_v29 }
 0x1b0   : > { %v1588_v32 = vpop.f32.mrf.mxu0 }
 0x1b1   : > { %v894_v56 = vmul.f32 %v736_v31, %v736_v31  ;;  %v751_v33 = vadd.f32 %v1588_v32, %v2025_v26  ;;  %v930_v34 = vsel %vm926_vm1, %v895_v30, 0.0 }
 0x1b2   : > { %931 = vadd.xlane.f32.xlu0 %v930_v34  ;;  %v745_v35 = vpop.f32.mrf.mxu0 }
 0x1b3   : > { %v897_v37 = vmul.f32 %v751_v33, %v751_v33  ;;  %v746_v38 = vadd.f32 %v2025_v26, %v745_v35  ;;  %v927_v39 = vsel %vm926_vm1, %v894_v56, 0.0 }
 0x1b4   : > { %v1591_v36 = vpop.f32.mrf.mxu1 }
 0x1b5   : > { %v896_v42 = vmul.f32 %v746_v38, %v746_v38  ;;  %v761_v43 = vadd.f32 %v1591_v36, %v2025_v26  ;;  %v936_v44 = vsel %vm926_vm1, %v897_v37, 0.0 }
 0x1b6   : > { %v755_v40 = vpop.f32.mrf.mxu1  ;;  %928 = vadd.xlane.f32.xlu0 %v927_v39 }
 0x1b7   : > { %v899_v47 = vmul.f32 %v761_v43, %v761_v43  ;;  %v756_v48 = vadd.f32 %v2025_v26, %v755_v40  ;;  %v933_v49 = vsel %vm926_vm1, %v896_v42, 0.0 }
 0x1b8   : > { %v1594_v41 = vpop.f32.mrf.mxu1 }
 0x1b9   : > { %v898_v52 = vmul.f32 %v756_v48, %v756_v48  ;;  %v771_v53 = vadd.f32 %v1594_v41, %v2025_v26  ;;  %v942_v54 = vsel %vm926_vm1, %v899_v47, 0.0 }
 0x1ba   : > { %v765_v45 = vpop.f32.mrf.mxu1  ;;  %937 = vadd.xlane.f32.xlu0 %v936_v44 }
 0x1bb   : > { %v901_v58 = vmul.f32 %v771_v53, %v771_v53  ;;  %v766_v59 = vadd.f32 %v2025_v26, %v765_v45  ;;  %v939_v60 = vsel %vm926_vm1, %v898_v52, 0.0 }
 0x1bc   : > { %v1597_v46 = vpop.f32.mrf.mxu1 }
 0x1bd   : > { %v900_v63 = vmul.f32 %v766_v59, %v766_v59  ;;  %v781_v0 = vadd.f32 %v1597_v46, %v2025_v26  ;;  %v948_v1 = vsel %vm926_vm1, %v901_v58, 0.0 }
 0x1be   : > { %v775_v50 = vpop.f32.mrf.mxu1  ;;  %934 = vadd.xlane.f32.xlu0 %v933_v49 }
 0x1bf   : > { %v776_v3 = vadd.f32 %v2025_v26, %v775_v50  ;;  %v903_v5 = vmul.f32 %v781_v0, %v781_v0  ;;  %v945_v7 = vsel %vm926_vm1, %v900_v63, 0.0 }
 0x1c0   : > { %v1600_v51 = vpop.f32.mrf.mxu1 }
 0x1c1   : > { %v902_v11 = vmul.f32 %v776_v3, %v776_v3  ;;  %v791_v12 = vadd.f32 %v1600_v51, %v2025_v26  ;;  %v954_v17 = vsel %vm926_vm1, %v903_v5, 0.0 }
 0x1c2   : > { %v785_v55 = vpop.f32.mrf.mxu1  ;;  %943 = vadd.xlane.f32.xlu0 %v942_v54 }
 0x1c3   : > { %v905_v19 = vmul.f32 %v791_v12, %v791_v12  ;;  %v786_v20 = vadd.f32 %v2025_v26, %v785_v55  ;;  %v951_v25 = vsel %vm926_vm1, %v902_v11, 0.0 }
 0x1c4   : > { %v1603_v57 = vpop.f32.mrf.mxu1 }
 0x1c5   : > { %v904_v28 = vmul.f32 %v786_v20, %v786_v20  ;;  %v801_v29 = vadd.f32 %v1603_v57, %v2025_v26  ;;  %v960_v33 = vsel %vm926_vm1, %v905_v19, 0.0 }
 0x1c6   : > { %v795_v61 = vpop.f32.mrf.mxu1  ;;  %940 = vadd.xlane.f32.xlu0 %v939_v60 }
 0x1c7   : > { %v796_v35 = vadd.f32 %v2025_v26, %v795_v61  ;;  %v907_v36 = vmul.f32 %v801_v29, %v801_v29  ;;  %v957_v41 = vsel %vm926_vm1, %v904_v28, 0.0 }
 0x1c8   : > { %v2041_v62 = vpop.f32.mrf.mxu1 }
 0x1c9   : > { %v906_v44 = vmul.f32 %v796_v35, %v796_v35  ;;  %v966_v50 = vsel %vm926_vm1, %v907_v36, 0.0  ;;  %v811_v58 = vadd.f32 %v2041_v62, %v2025_v26 }
 0x1ca   : > { %v805_v2 = vpop.f32.mrf.mxu1  ;;  %949 = vadd.xlane.f32.xlu0 %v948_v1 }
 0x1cb   : > { %v806_v47 = vadd.f32 %v2025_v26, %v805_v2  ;;  %v963_v2 = vsel %vm926_vm1, %v906_v44, 0.0  ;;  %v909_v11 = vmul.f32 %v811_v58, %v811_v58 }
 0x1cc   : > { %v1609_v4 = vpop.f32.mrf.mxu1 }
 0x1cd   : > { %v821_v6 = vadd.f32 %v1609_v4, %v2025_v26  ;;  %v908_v63 = vmul.f32 %v806_v47, %v806_v47 }
 0x1ce   : > { %v815_v8 = vpop.f32.mrf.mxu1  ;;  %946 = vadd.xlane.f32.xlu0 %v945_v7 }
 0x1cf   : > { %v911_v9 = vmul.f32 %v821_v6, %v821_v6  ;;  %v816_v10 = vadd.f32 %v2025_v26, %v815_v8 }
 0x1d0   : > { %v1612_v13 = vpop.f32.mrf.mxu1 }
 0x1d1   : > { %v910_v14 = vmul.f32 %v816_v10, %v816_v10  ;;  %v831_v15 = vadd.f32 %v1612_v13, %v2025_v26  ;;  %v978_v16 = vsel %vm926_vm1, %v911_v9, 0.0  ;;  %v969_v13 = vsel %vm926_vm1, %v908_v63, 0.0 }
 0x1d2   : > { %979 = vadd.xlane.f32.xlu1 %v978_v16  ;;  %v825_v18 = vpop.f32.mrf.mxu1  ;;  %955 = vadd.xlane.f32.xlu0 %v954_v17 }
 0x1d3   : > { %v913_v22 = vmul.f32 %v831_v15, %v831_v15  ;;  %v826_v23 = vadd.f32 %v2025_v26, %v825_v18  ;;  %v975_v24 = vsel %vm926_vm1, %v910_v14, 0.0 }
 0x1d4   : > { %v1615_v21 = vpop.f32.mrf.mxu1 }
 0x1d5   : > { %v912_v31 = vmul.f32 %v826_v23, %v826_v23  ;;  %v841_v32 = vadd.f32 %v1615_v21, %v2025_v26  ;;  %v984_v56 = vsel %vm926_vm1, %v913_v22, 0.0 }
 0x1d6   : > { %976 = vadd.xlane.f32.xlu1 %v975_v24  ;;  %952 = vadd.xlane.f32.xlu0 %v951_v25  ;;  %v835_v27 = vpop.f32.mrf.mxu1  ;;  %v972_v24 = vsel %vm926_vm1, %v909_v11, 0.0 }
 0x1d7   : > { %v836_v37 = vadd.f32 %v2025_v26, %v835_v27  ;;  %v915_v39 = vmul.f32 %v841_v32, %v841_v32  ;;  %v981_v40 = vsel %vm926_vm1, %v912_v31, 0.0 }
 0x1d8   : > { %v1618_v30 = vpop.f32.mrf.mxu1 }
 0x1d9   : > { %v914_v48 = vmul.f32 %v836_v37, %v836_v37  ;;  %v851_v49 = vadd.f32 %v1618_v30, %v2025_v26  ;;  %v990_v52 = vsel %vm926_vm1, %v915_v39, 0.0 }
 0x1da   : > { %985 = vadd.xlane.f32.xlu1 %v984_v56  ;;  %961 = vadd.xlane.f32.xlu0 %v960_v33  ;;  %v845_v34 = vpop.f32.mrf.mxu1  ;;  %v1071_v33 = vlaneseq }
 0x1db   : > { %v917_v0 = vmul.f32 %v851_v49, %v851_v49  ;;  %v846_v1 = vadd.f32 %v2025_v26, %v845_v34  ;;  %v987_v4 = vsel %vm926_vm1, %v914_v48, 0.0 }
 0x1dc   : > { %v1621_v38 = vpop.f32.mrf.mxu1  ;;  %v2094_v35 = vand.u32 127, %v1071_v33 }
 0x1dd   : > { %v861_v42 = vadd.f32 %v1621_v38, %v2025_v26  ;;  %v916_v12 = vmul.f32 %v846_v1, %v846_v1  ;;  %v996_v15 = vsel %vm926_vm1, %v917_v0, 0.0  ;;  %v2097_v38 = vshrl.u32 %v1071_v33, 7 }
 0x1de   : > { %982 = vadd.xlane.f32.xlu1 %v981_v40  ;;  %958 = vadd.xlane.f32.xlu0 %v957_v41  ;;  %v855_v43 = vpop.f32.mrf.mxu1  ;;  %v1084_v36 = vadd.s32 4294967280, %v2094_v35  ;;  %v1077_v39 = vadd.s32 4294967288, %v2094_v35  ;;  %v1119_v0 = vadd.s32 4294967240, %v2094_v35 }
 0x1df   : > { %v919_v45 = vmul.f32 %v861_v42, %v861_v42  ;;  %v856_v46 = vadd.f32 %v2025_v26, %v855_v43  ;;  %v993_v23 = vsel %vm926_vm1, %v916_v12, 0.0  ;;  %v2102_v40 = vsub.s32 %v2094_v35, %v2097_v38 }
 0x1e0   : > { %v1624_v51 = vpop.f32.mrf.mxu1  ;;  %v1091_v42 = vadd.s32 4294967272, %v2094_v35  ;;  %v2106_v43 = vsub.s32 %v1084_v36, %v2097_v38  ;;  %v2112_v48 = vsub.s32 %v1077_v39, %v2097_v38  ;;  %v2143_v11 = vsub.s32 %v1119_v0, %v2097_v38 }
 0x1e1   : > { %v918_v53 = vmul.f32 %v856_v46, %v856_v46  ;;  %v871_v54 = vadd.f32 %v1624_v51, %v2025_v26  ;;  %v1002_v55 = vsel %vm926_vm1, %v919_v45, 0.0  ;;  %v1098_v45 = vadd.s32 4294967264, %v2094_v35 }
 0x1e2   : > { %991 = vadd.xlane.f32.xlu1 %v990_v52  ;;  %967 = vadd.xlane.f32.xlu0 %v966_v50  ;;  %v865_v57 = vpop.f32.mrf.mxu1  ;;  %v1112_v51 = vadd.s32 4294967248, %v2094_v35  ;;  %v2117_v52 = vsub.s32 %v1091_v42, %v2097_v38  ;;  %v1140_v12 = vadd.s32 4294967216, %v2094_v35  ;;  %v1161_v36 = vadd.s32 4294967192, %v2094_v35 }
 0x1e3   : > { %v921_v59 = vmul.f32 %v871_v54, %v871_v54  ;;  %v866_v60 = vadd.f32 %v2025_v26, %v865_v57  ;;  %v999_v61 = vsel %vm926_vm1, %v918_v53, 0.0  ;;  %v2121_v54 = vsub.s32 %v1098_v45, %v2097_v38 }
 0x1e4   : > { %v1627_v3 = vpop.f32.mrf.mxu1  ;;  %v2130_v1 = vsub.s32 %v1112_v51, %v2097_v38  ;;  %v1168_v45 = vadd.s32 4294967184, %v2094_v35 }
 0x1e5   : > { %v920_v5 = vmul.f32 %v866_v60, %v866_v60  ;;  %v881_v6 = vadd.f32 %v1627_v3, %v2025_v26  ;;  %v1008_v7 = vsel %vm926_vm1, %v921_v59, 0.0 }
 0x1e6   : > { %988 = vadd.xlane.f32.xlu1 %v987_v4  ;;  %964 = vadd.xlane.f32.xlu0 %v963_v2  ;;  %v875_v62 = vpop.f32.mrf.mxu1 }
 0x1e7   : > { %v923_v8 = vmul.f32 %v881_v6, %v881_v6  ;;  %v876_v9 = vadd.f32 %v2025_v26, %v875_v62  ;;  %v1005_v10 = vsel %vm926_vm1, %v920_v5, 0.0  ;;  %v1126_v5 = vadd.s32 4294967232, %v2094_v35 }
 0x1e8   : > { %v1630_v14 = vpop.f32.mrf.mxu1 }
 0x1e9   : > { %v922_v16 = vmul.f32 %v876_v9, %v876_v9  ;;  %v891_v17 = vadd.f32 %v1630_v14, %v2025_v26  ;;  %v1014_v18 = vsel %vm926_vm1, %v923_v8, 0.0 }
 0x1ea   : > { %997 = vadd.xlane.f32.xlu1 %v996_v15  ;;  %970 = vadd.xlane.f32.xlu0 %v969_v13  ;;  %v885_v19 = vpop.f32.mrf.mxu1  ;;  %v2149_v15 = vsub.s32 %v1126_v5, %v2097_v38 }
 0x1eb   : > { %v925_v20 = vmul.f32 %v891_v17, %v891_v17  ;;  %v886_v21 = vadd.f32 %v2025_v26, %v885_v19  ;;  %v1011_v22 = vsel %vm926_vm1, %v922_v16, 0.0 }
 0x1ed   : > { %v924_v25 = vmul.f32 %v886_v21, %v886_v21  ;;  %v1020_v27 = vsel %vm926_vm1, %v925_v20, 0.0  ;;  %v1133_v21 = vadd.s32 4294967224, %v2094_v35 }
 0x1ee   : > { %994 = vadd.xlane.f32.xlu1 %v993_v23  ;;  %973 = vadd.xlane.f32.xlu0 %v972_v24  ;;  %v1147_v23 = vadd.s32 4294967208, %v2094_v35  ;;  %v2158_v24 = vsub.s32 %v1140_v12, %v2097_v38 }
 0x1ef   : > { %v1017_v28 = vsel %vm926_vm1, %v924_v25, 0.0 }
 0x1f2   : > { %1003 = vadd.xlane.f32.xlu1 %v1002_v55 }
 0x1f6   : > { %1000 = vadd.xlane.f32.xlu1 %v999_v61  ;;  %v1105_v61 = vadd.s32 4294967256, %v2094_v35 }
 0x1f8   : > { %v2139_v8 = vsub.s32 %v1105_v61, %v2097_v38  ;;  %v2189_v61 = vsub.s32 %v1168_v45, %v2097_v38 }
 0x1fa   : > { %1009 = vadd.xlane.f32.xlu1 %v1008_v7 }
 0x1fe   : > { %1006 = vadd.xlane.f32.xlu1 %v1005_v10 }
 0x202   : > { %1015 = vadd.xlane.f32.xlu1 %v1014_v18 }
 0x206   : > { %1012 = vadd.xlane.f32.xlu1 %v1011_v22 }
 0x20a   : > { %1018 = vadd.xlane.f32.xlu1 %v1017_v28 }
 0x20e   : > { %1021 = vadd.xlane.f32.xlu1 %v1020_v27 }
 0x23b   : > { %v932_v26 = vpop.xlane.xlu0 %931 }
 0x23c   : > { %v1024_v49 = vmul.f32 0.03125, %v932_v26 }
 0x23e   : > { %v1081_v59 = vrot.slane %v1024_v49, %v2112_v48 }
 0x23f   : > { %v929_v29 = vpop.xlane.xlu0 %928 }
 0x240   : > { %v1023_v41 = vmul.f32 0.03125, %v929_v29 }
 0x242   : > { %v1076_v50 = vrot.slane %v1023_v41, %v2102_v40 }
 0x243   : > { %v938_v30 = vpop.xlane.xlu0 %937 }
 0x244   : > { %v1026_v60 = vmul.f32 0.03125, %v938_v30  ;;  %v1083_v63 = vsel %vm1082_vm2, %v1081_v59, %v1076_v50  ;;  %v1154_v30 = vadd.s32 4294967200, %v2094_v35 }
 0x246   : > { %v1095_v62 = vrot.slane %v1026_v60, %v2117_v52  ;;  %v2177_v42 = vsub.s32 %v1154_v30, %v2097_v38 }
 0x247   : > { %v935_v31 = vpop.xlane.xlu0 %934 }
 0x248   : > { %v1025_v44 = vmul.f32 0.03125, %v935_v31 }
 0x24a   : > { %v1088_v53 = vrot.slane %v1025_v44, %v2106_v43 }
 0x24b   : > { %v944_v32 = vpop.xlane.xlu0 %943 }
 0x24c   : > { %v1090_v2 = vsel %vm1089_vm3, %v1088_v53, %v1083_v63  ;;  %v1028_v9 = vmul.f32 0.03125, %v944_v32  ;;  %v2167_v32 = vsub.s32 %v1133_v21, %v2097_v38  ;;  %v2183_v53 = vsub.s32 %v1161_v36, %v2097_v38 }
 0x24d   : > { %v1097_v10 = vsel %vm1096_vm4, %v1095_v62, %v1090_v2 }
 0x24e   : > { %v1109_v19 = vrot.slane %v1028_v9, %v2139_v8 }
 0x24f   : > { %v941_v56 = vpop.xlane.xlu0 %940 }
 0x250   : > { %v1027_v55 = vmul.f32 0.03125, %v941_v56 }
 0x252   : > { %v1102_v3 = vrot.slane %v1027_v55, %v2121_v54  ;;  %v1175_v55 = vadd.s32 4294967176, %v2094_v35 }
 0x253   : > { %v950_v34 = vpop.xlane.xlu0 %949 }
 0x254   : > { %v1104_v13 = vsel %vm1103_vm5, %v1102_v3, %v1097_v10  ;;  %v1030_v20 = vmul.f32 0.03125, %v950_v34  ;;  %v2171_v34 = vsub.s32 %v1147_v23, %v2097_v38  ;;  %v2195_v35 = vsub.s32 %v1175_v55, %v2097_v38 }
 0x255   : > { %v1111_v22 = vsel %vm1110_vm6, %v1109_v19, %v1104_v13 }
 0x256   : > { %v1123_v31 = vrot.slane %v1030_v20, %v2143_v11 }
 0x257   : > { %v947_v37 = vpop.xlane.xlu0 %946 }
 0x258   : > { %v1029_v4 = vmul.f32 0.03125, %v947_v37 }
 0x25a   : > { %v1116_v14 = vrot.slane %v1029_v4, %v2130_v1 }
 0x25b   : > { %v2109_v46 = vpop.xlane.xlu1 %979  ;;  %v956_v47 = vpop.xlane.xlu0 %955 }
 0x25c   : > { %v1118_v25 = vsel %vm1117_vm7, %v1116_v14, %v1111_v22  ;;  %v1032_v56 = vmul.f32 0.03125, %v956_v47  ;;  %v1040_v20 = vmul.f32 0.03125, %v2109_v46 }
 0x25d   : > { %v1125_v33 = vsel %vm1124_vm8, %v1123_v31, %v1118_v25 }
 0x25e   : > { %v1137_v47 = vrot.slane %v1032_v56, %v2167_v32 }
 0x25f   : > { %v2123_v57 = vpop.xlane.xlu1 %976  ;;  %v953_v58 = vpop.xlane.xlu0 %952 }
 0x260   : > { %v1031_v16 = vmul.f32 0.03125, %v953_v58  ;;  %v1039_v13 = vmul.f32 0.03125, %v2123_v57 }
 0x262   : > { %v1130_v27 = vrot.slane %v1031_v16, %v2149_v15  ;;  %v1202_v22 = vrot.slane %v1039_v13, %v2102_v40 }
 0x263   : > { %v2135_v6 = vpop.xlane.xlu1 %985  ;;  %v962_v7 = vpop.xlane.xlu0 %961 }
 0x264   : > { %v1132_v37 = vsel %vm1131_vm9, %v1130_v27, %v1125_v33  ;;  %v1034_v49 = vmul.f32 0.03125, %v962_v7  ;;  %v1206_v27 = vrot.slane %v1040_v20, %v2112_v48 }
 0x265   : > { %v1139_v51 = vsel %vm1138_vm10, %v1137_v47, %v1132_v37 }
 0x266   : > { %v1151_v0 = vrot.slane %v1034_v49, %v2171_v34 }
 0x267   : > { %v2151_v17 = vpop.xlane.xlu1 %982  ;;  %v959_v18 = vpop.xlane.xlu0 %958 }
 0x268   : > { %v1033_v28 = vmul.f32 0.03125, %v959_v18  ;;  %v1041_v16 = vmul.f32 0.03125, %v2151_v17  ;;  %v1042_v17 = vmul.f32 0.03125, %v2135_v6 }
 0x26a   : > { %v1144_v39 = vrot.slane %v1033_v28, %v2158_v24  ;;  %v1211_v57 = vrot.slane %v1041_v16, %v2106_v43  ;;  %v1207_v28 = vsel %vm1082_vm2, %v1206_v27, %v1202_v22  ;;  %v1216_v56 = vrot.slane %v1042_v17, %v2117_v52 }
 0x26b   : > { %v2162_v26 = vpop.xlane.xlu1 %991  ;;  %v968_v29 = vpop.xlane.xlu0 %967 }
 0x26c   : > { %v1146_v58 = vsel %vm1145_vm11, %v1144_v39, %v1139_v51  ;;  %v1036_v2 = vmul.f32 0.03125, %v968_v29  ;;  %v1212_v46 = vsel %vm1089_vm3, %v1211_v57, %v1207_v28  ;;  %v1044_v40 = vmul.f32 0.03125, %v2162_v26 }
 0x26d   : > { %v1153_v4 = vsel %vm1152_vm12, %v1151_v0, %v1146_v58  ;;  %v1217_v43 = vsel %vm1096_vm4, %v1216_v56, %v1212_v46 }
 0x26e   : > { %v1165_v10 = vrot.slane %v1036_v2, %v2183_v53  ;;  %v1226_v37 = vrot.slane %v1044_v40, %v2139_v8 }
 0x26f   : > { %v989_v41 = vpop.xlane.xlu1 %988  ;;  %v965_v44 = vpop.xlane.xlu0 %964 }
 0x270   : > { %v1035_v50 = vmul.f32 0.03125, %v965_v44  ;;  %v1043_v23 = vmul.f32 0.03125, %v989_v41 }
 0x272   : > { %v1158_v59 = vrot.slane %v1035_v50, %v2177_v42  ;;  %v1221_v29 = vrot.slane %v1043_v23, %v2121_v54 }
 0x273   : > { %v998_v60 = vpop.xlane.xlu1 %997  ;;  %v971_v63 = vpop.xlane.xlu0 %970 }
 0x274   : > { %v1037_v3 = vmul.f32 0.03125, %v971_v63  ;;  %v1160_v5 = vsel %vm1159_vm13, %v1158_v59, %v1153_v4  ;;  %v1222_v33 = vsel %vm1103_vm5, %v1221_v29, %v1217_v43  ;;  %v1046_v39 = vmul.f32 0.03125, %v998_v60 }
 0x275   : > { %v1167_v14 = vsel %vm1166_vm14, %v1165_v10, %v1160_v5  ;;  %v1227_v41 = vsel %vm1110_vm6, %v1226_v37, %v1222_v33 }
 0x276   : > { %v1172_v7 = vrot.slane %v1037_v3, %v2189_v61  ;;  %v1236_v26 = vrot.slane %v1046_v39, %v2143_v11 }
 0x277   : > { %v995_v62 = vpop.xlane.xlu1 %994  ;;  %v974_v9 = vpop.xlane.xlu0 %973 }
 0x278   : > { %v1038_v12 = vmul.f32 0.03125, %v974_v9  ;;  %v1174_v18 = vsel %vm1173_vm15, %v1172_v7, %v1167_v14  ;;  %v1045_v30 = vmul.f32 0.03125, %v995_v62 }
 0x27a   : > { %v1179_v38 = vrot.slane %v1038_v12, %v2195_v35  ;;  %v1231_v48 = vrot.slane %v1045_v30, %v2130_v1 }
 0x27b   : > { %v1004_v19 = vpop.xlane.xlu1 %1003 }
 0x27c   : > { %v1181_v21 = vsel %vm1180_vm0, %v1179_v38, %v1174_v18  ;;  %v1232_v54 = vsel %vm1117_vm7, %v1231_v48, %v1227_v41  ;;  %v1048_v47 = vmul.f32 0.03125, %v1004_v19 }
 0x27d   : > { %1182 = vst [vmem:[%s2209_s22] ss:$2 sm:$0x1] %v1181_v21  ;;  %v1237_v49 = vsel %vm1124_vm8, %v1236_v26, %v1232_v54 }
 0x27e   : > { %v1246_v8 = vrot.slane %v1048_v47, %v2167_v32 }
 0x27f   : > { %v1001_v25 = vpop.xlane.xlu1 %1000 }
 0x280   : > { %v1047_v36 = vmul.f32 0.03125, %v1001_v25 }
 0x282   : > { %v1241_v44 = vrot.slane %v1047_v36, %v2149_v15 }
 0x283   : > { %v1010_v31 = vpop.xlane.xlu1 %1009 }
 0x284   : > { %v1242_v1 = vsel %vm1131_vm9, %v1241_v44, %v1237_v49  ;;  %v1050_v55 = vmul.f32 0.03125, %v1010_v31 }
 0x285   : > { %v1247_v59 = vsel %vm1138_vm10, %v1246_v8, %v1242_v1 }
 0x286   : > { %v1256_v63 = vrot.slane %v1050_v55, %v2171_v34 }
 0x287   : > { %v1007_v6 = vpop.xlane.xlu1 %1006 }
 0x288   : > { %v1049_v52 = vmul.f32 0.03125, %v1007_v6 }
 0x28a   : > { %v1251_v50 = vrot.slane %v1049_v52, %v2158_v24 }
 0x28b   : > { %v1016_v45 = vpop.xlane.xlu1 %1015 }
 0x28c   : > { %v1252_v15 = vsel %vm1145_vm11, %v1251_v50, %v1247_v59  ;;  %v1052_v0 = vmul.f32 0.03125, %v1016_v45 }
 0x28d   : > { %v1257_v2 = vsel %vm1152_vm12, %v1256_v63, %v1252_v15 }
 0x28e   : > { %v1266_v5 = vrot.slane %v1052_v0, %v2183_v53 }
 0x28f   : > { %v1013_v51 = vpop.xlane.xlu1 %1012 }
 0x290   : > { %v1051_v58 = vmul.f32 0.03125, %v1013_v51 }
 0x292   : > { %v1261_v11 = vrot.slane %v1051_v58, %v2177_v42 }
 0x293   : > { %v1019_v60 = vpop.xlane.xlu1 %1018 }
 0x294   : > { %v1053_v24 = vmul.f32 0.03125, %v1019_v60  ;;  %v1262_v32 = vsel %vm1159_vm13, %v1261_v11, %v1257_v2 }
 0x295   : > { %v1267_v42 = vsel %vm1166_vm14, %v1266_v5, %v1262_v32 }
 0x296   : > { %v1271_v3 = vrot.slane %v1053_v24, %v2189_v61 }
 0x297   : > { %v1022_v4 = vpop.xlane.xlu1 %1021 }
 0x298   : > { %v1054_v7 = vmul.f32 0.03125, %v1022_v4  ;;  %v1272_v62 = vsel %vm1173_vm15, %v1271_v3, %v1267_v42 }
 0x29a   : > { %v1276_v34 = vrot.slane %v1054_v7, %v2195_v35 }
 0x29c   : > { %v1277_v9 = vsel %vm1180_vm0, %v1276_v34, %v1272_v62 }
 0x29d   : > { %1394 = vst [vmem:[%s2209_s22 + $0x1] ss:$2 sm:$0x1] %v1277_v9 }
 0x29e   : > { %1715 = shalt.err (!%p1712_p3)
}
 0x29f   : > { %s1716_s9 = scalar_lea.hbm %s2249_s30, 32  ;;  %s1720_s14 = scalar_lea.hbm %s2293_s5, 64 }
 0x2a0   : > { %p1717_p4 = scmp.ne.s32.totalorder %s2249_s30, %s1716_s9  ;;  %p1721_p9 = scmp.lt.s32.totalorder %s2249_s30, %s2293_s5 }
 0x2a1   : > { %p1722_p10 = scmp.lt.s32.totalorder %s1720_s14, %s1716_s9 }
 0x2a2   : > { %p1718_p7 = pnand %p1717_p4, %p1830_p5 }
 0x2a3   : > { %p1723_p11 = por %p1722_p10, %p1721_p9 }
 0x2a4   : > { %p1719_p8 = pneg %p1718_p7 }
 0x2a6   : > { %p1724_p12 = pnand %p1723_p11, %p1719_p8 }
 0x2a8   : > { %1727 = shalt.err (!%p1724_p12)
}
 0x2a9   : > { %1663 = dma.vmem_to_hbm [thread:$0]  (%p1830_p5), %s1295_s23, 32, %s2249_s30, %s1281_s6  }
 0x2aa PF: > { %p1669_p13 = scmp.ge.s32.totalorder %s1762_s21, 2  ;;  %s1306_s17 = sand.u32 1, %s1750_s18  }
 0x2ab   : > { %s1307_s22 = scalar_lea.sflag [#allocation3], %s1306_s17 }
 0x2ac   : > { %p1666_p0 = pnand %p1669_p13, %p1834_p6 }
 0x2ae   : > { %p1667_p1 = pneg %p1666_p0 }
 0x2b0   : > { %1745 = dma.done.wait (%p1667_p1), %s1307_s22, 32  }
 0x2b1   : > { %1747 = vsyncadd (%p1667_p1), %s1307_s22, 4294967264  ;;  %p15_p2 = scmp.ge.s32.totalorder %s1818_s24, 4   ;;  %s2296_s18 = smov %s1754_s19 }
 0x2b2   : > { %s2297_s19 = smov %s1758_s20  ;;  %s2298_s20 = smov %s1828_s27 }
 0x2b3   : > { %s2299_s21 = smov %s1818_s24  ;;  %17 = sbr.rel (!%p15_p2) target bundleno = 3 (0x3), region = 76 }
 0x2b8   :  { %1312 = vsyncpa [#allocation3], 1 }
 0x2b9   :  { %1314 = vsyncpa [#allocation3 + $0x1], 1 }

</bundles_post_ra>
